<compile_context>
chip_gen: v7x
topology: tpu7x:2x2x1
jax: 0.10.0
libtpu: 0.0.40
codegen_flags: <defaults>
</compile_context>

<pallas_src>
import functools

import jax
import jax.numpy as jnp
from jax.experimental import pallas as pl
from jax.experimental.pallas import tpu as pltpu

_OUT_LANES = 128  # lane-dense per-tile partial-sum slot


def _cdiv(a, b):
    return -(-a // b)


def _row_weighted_sq_err(pred_ref, gt_ref, inv_hw):
    """Per-row sum of (pred-gt)^2 * loss_weight, without materializing lw."""
    pred = pred_ref[...].astype(jnp.float32)            # (TR, HW)
    gt = gt_ref[...].astype(jnp.float32)                # (TR, HW)

    diff = pred - gt
    d2 = diff * diff
    nz = (gt != 0.0).astype(jnp.float32)                # (TR, HW)

    s_all = jnp.sum(d2, axis=-1, keepdims=True)         # (TR, 1)
    s_nz = jnp.sum(d2 * nz, axis=-1, keepdims=True)     # (TR, 1)
    cnt = jnp.sum(nz, axis=-1, keepdims=True)           # (TR, 1)

    pw = 1.0 - cnt * inv_hw                             # (TR, 1)
    # = sum over HW of d2 * where(gt!=0, pw, 1-pw)
    return pw * s_nz + (1.0 - pw) * (s_all - s_nz)      # (TR, 1)


def _joints_mse_kernel(pred_ref, gt_ref, out_ref, *, inv_hw):
    row_sum = _row_weighted_sq_err(pred_ref, gt_ref, inv_hw)
    partial = jnp.sum(row_sum)                           # scalar, f32
    out_ref[...] = jnp.broadcast_to(partial, (1, _OUT_LANES))


def _joints_mse_tw_kernel(pred_ref, gt_ref, tw_ref, out_ref, *, inv_hw):
    row_sum = _row_weighted_sq_err(pred_ref, gt_ref, inv_hw)
    tw = tw_ref[...].astype(jnp.float32)                 # (TR, 1)
    # sum over rows of mean_sq_weighted_err * target_weight
    partial = jnp.sum(row_sum * tw) * inv_hw
    out_ref[...] = jnp.broadcast_to(partial, (1, _OUT_LANES))


def joints_mse_with_weight_loss(output, target, target_weight, *,
                                use_target_weight=False, loss_weight=1.0):
    b, j, h, w = output.shape
    hw = h * w
    rows = b * j
    itemsize = int(jnp.dtype(output.dtype).itemsize)

    pred2d = output.reshape(rows, hw)
    gt2d = target.reshape(rows, hw)
    tw2d = target_weight.reshape(rows, 1).astype(jnp.float32)

    # --- Row-tile choice: 2 inputs x 2 pipeline buffers must fit comfortably
    #     under the smallest default scoped-VMEM budget (16 MiB on v5e).
    stream_budget = 8 * 1024 * 1024                      # bytes for 4 buffers
    tr = stream_budget // (4 * hw * itemsize)
    tr = min(int(tr), rows, 4096)
    tr = max(8, (tr // 8) * 8)                           # sublane multiple of 8
    num_tiles = _cdiv(rows, tr)
    rows_pad = num_tiles * tr

    if rows_pad != rows:
        pad = rows_pad - rows
        # Zero rows: diff=0, nz=0, tw=0  ->  0 contribution to every partial.
        pred2d = jnp.pad(pred2d, ((0, pad), (0, 0)))
        gt2d = jnp.pad(gt2d, ((0, pad), (0, 0)))
        tw2d_p = jnp.pad(tw2d, ((0, pad), (0, 0)))
    else:
        tw2d_p = tw2d

    inv_hw = 1.0 / float(hw)
    heatmap_spec = pl.BlockSpec((tr, hw), lambda i: (i, 0))

    if use_target_weight:
        kernel = functools.partial(_joints_mse_tw_kernel, inv_hw=inv_hw)
        in_specs = [heatmap_spec, heatmap_spec,
                    pl.BlockSpec((tr, 1), lambda i: (i, 0))]
        operands = (pred2d, gt2d, tw2d_p)
        tw_bytes = rows_pad * 4
    else:
        kernel = functools.partial(_joints_mse_kernel, inv_hw=inv_hw)
        in_specs = [heatmap_spec, heatmap_spec]
        operands = (pred2d, gt2d)
        tw_bytes = 0

    cost = pl.CostEstimate(
        flops=6 * rows_pad * hw,
        transcendentals=0,
        bytes_accessed=2 * rows_pad * hw * itemsize + tw_bytes
                       + num_tiles * _OUT_LANES * 4,
    )

    partials = pl.pallas_call(
        kernel,
        out_shape=jax.ShapeDtypeStruct((1, num_tiles * _OUT_LANES), jnp.float32),
        grid=(num_tiles,),
        in_specs=in_specs,
        out_specs=pl.BlockSpec((1, _OUT_LANES), lambda i: (0, i)),
        compiler_params=pltpu.CompilerParams(
            dimension_semantics=("parallel",)),
        cost_estimate=cost,
    )(*operands)

    # Tiny final reduction + all scalar normalisation outside the hot loop.
    total = jnp.sum(partials.reshape(num_tiles, _OUT_LANES)[:, 0])
    if use_target_weight:
        loss = total / jnp.sum(tw2d)
    else:
        loss = total / float(rows * hw)
    return loss / float(loss_weight)


def _ref_loss(output, target, target_weight, *, use_target_weight, loss_weight):
    b, j, _, _ = output.shape
    hp = output.reshape(b, j, -1).astype(jnp.float32)
    hg = target.reshape(b, j, -1).astype(jnp.float32)
    nz = hg != 0
    pos_values = nz.sum(-1).astype(jnp.float32)
    pw = (1.0 - pos_values / hg.shape[-1])[..., None]
    lw = jnp.where(nz, pw, 1.0 - pw)
    loss = (hp - hg) ** 2 * lw
    if use_target_weight:
        loss = loss.mean(-1, keepdims=True)
        loss = loss * target_weight
        loss = loss.sum() / target_weight.sum()
    else:
        loss = loss.mean()
    return loss / loss_weight


def _make_inputs(key, b, j, h, w):
    k1, k2, k3 = jax.random.split(key, 3)
    output = jax.random.normal(k1, (b, j, h, w), dtype=jnp.float32)
    # synthetic "heatmap" target with plenty of exact zeros
    raw = jax.random.uniform(k2, (b, j, h, w), dtype=jnp.float32)
    target = jnp.where(raw > 0.7, raw, 0.0)
    target_weight = jax.random.uniform(
        k3, (b, j, 1), dtype=jnp.float32, minval=0.1, maxval=1.0)
    return output, target, target_weight


if __name__ == "__main__":
    key = jax.random.PRNGKey(0)
    k_a, k_b = jax.random.split(key)

    # (B, J, H, W): second case has rows (=B*J) not a multiple of the row tile,
    # exercising the zero-padded multi-tile path.
    cases = [
        (k_a, 2, 4, 16, 16),
        (k_b, 3, 5, 8, 16),
    ]

    for ck, B, J, H, W in cases:
        output, target, target_weight = _make_inputs(ck, B, J, H, W)
        for use_tw in (False, True):
            got = joints_mse_with_weight_loss(
                output, target, target_weight,
                use_target_weight=use_tw, loss_weight=1.0)
            got = jax.block_until_ready(got)
            want = _ref_loss(output, target, target_weight,
                             use_target_weight=use_tw, loss_weight=1.0)
            assert jnp.allclose(got, want, rtol=1e-5, atol=1e-6), \
                (B, J, H, W, use_tw, got, want)

    print("KERNEL_OK")
</pallas_src>

<mosaic_0001>
module attributes {stable_mosaic.version = 11 : i64} {
  func.func @_joints_mse_kernel(%arg0: i32, %arg1: memref<8x256xf32, #tpu.memory_space<vmem>>, %arg2: memref<8x256xf32, #tpu.memory_space<vmem>>, %arg3: memref<1x128xf32, #tpu.memory_space<vmem>>) attributes {dimension_semantics = [#tpu.dimension_semantics<parallel>], iteration_bounds = array<i64: 1>, scalar_prefetch = 0 : i64, scratch_operands = 0 : i64, tpu.core_type = #tpu.core_type<tc>, window_params = [{transform_indices = @transform_0, window_bounds = array<i64: 8, 256>}, {transform_indices = @transform_1, window_bounds = array<i64: 8, 256>}, {transform_indices = @transform_2, window_bounds = array<i64: 1, 128>}]} {
    %c0 = arith.constant 0 : index
    %c0_0 = arith.constant 0 : index
    %0 = vector.load %arg1[%c0, %c0_0] : memref<8x256xf32, #tpu.memory_space<vmem>>, vector<8x256xf32>
    %c0_1 = arith.constant 0 : index
    %c0_2 = arith.constant 0 : index
    %1 = vector.load %arg2[%c0_1, %c0_2] : memref<8x256xf32, #tpu.memory_space<vmem>>, vector<8x256xf32>
    %2 = arith.subf %0, %1 : vector<8x256xf32>
    %3 = arith.mulf %2, %2 : vector<8x256xf32>
    %cst = arith.constant 0.000000e+00 : f32
    %4 = vector.broadcast %cst : f32 to vector<8x256xf32>
    %5 = arith.cmpf one, %1, %4 : vector<8x256xf32>
    %6 = arith.extui %5 : vector<8x256xi1> to vector<8x256xi32>
    %7 = arith.sitofp %6 : vector<8x256xi32> to vector<8x256xf32>
    %cst_3 = arith.constant dense<0.000000e+00> : vector<8xf32>
    %8 = vector.multi_reduction <add>, %3, %cst_3 [1] : vector<8x256xf32> to vector<8xf32>
    %9 = vector.shape_cast %8 : vector<8xf32> to vector<8x1xf32>
    %10 = arith.mulf %3, %7 : vector<8x256xf32>
    %cst_4 = arith.constant dense<0.000000e+00> : vector<8xf32>
    %11 = vector.multi_reduction <add>, %10, %cst_4 [1] : vector<8x256xf32> to vector<8xf32>
    %12 = vector.shape_cast %11 : vector<8xf32> to vector<8x1xf32>
    %cst_5 = arith.constant dense<0.000000e+00> : vector<8xf32>
    %13 = vector.multi_reduction <add>, %7, %cst_5 [1] : vector<8x256xf32> to vector<8xf32>
    %14 = vector.shape_cast %13 : vector<8xf32> to vector<8x1xf32>
    %cst_6 = arith.constant 3.906250e-03 : f32
    %15 = vector.broadcast %cst_6 : f32 to vector<8x1xf32>
    %16 = arith.mulf %14, %15 : vector<8x1xf32>
    %cst_7 = arith.constant 1.000000e+00 : f32
    %17 = vector.broadcast %cst_7 : f32 to vector<8x1xf32>
    %18 = arith.subf %17, %16 : vector<8x1xf32>
    %19 = arith.mulf %18, %12 : vector<8x1xf32>
    %cst_8 = arith.constant 1.000000e+00 : f32
    %20 = vector.broadcast %cst_8 : f32 to vector<8x1xf32>
    %21 = arith.subf %20, %18 : vector<8x1xf32>
    %22 = arith.subf %9, %12 : vector<8x1xf32>
    %23 = arith.mulf %21, %22 : vector<8x1xf32>
    %24 = arith.addf %19, %23 : vector<8x1xf32>
    %25 = vector.shape_cast %24 : vector<8x1xf32> to vector<1x8x1xf32>
    %cst_9 = arith.constant dense<0.000000e+00> : vector<1xf32>
    %26 = vector.multi_reduction <add>, %25, %cst_9 [1, 2] : vector<1x8x1xf32> to vector<1xf32>
    %27 = vector.shape_cast %26 : vector<1xf32> to vector<1x1x1xf32>
    %28 = vector.extract %27[0, 0, 0] : f32 from vector<1x1x1xf32>
    %29 = vector.broadcast %28 : f32 to vector<1x128xf32>
    %c0_10 = arith.constant 0 : index
    %c0_11 = arith.constant 0 : index
    %30 = vector.load %arg3[%c0_10, %c0_11] : memref<1x128xf32, #tpu.memory_space<vmem>>, vector<1x128xf32>
    tpu.vector_store %arg3[%c0_10, %c0_11], %29 {strides = array<i32>} : memref<1x128xf32, #tpu.memory_space<vmem>>, vector<1x128xf32>,
    return
  }
  func.func @transform_0(%arg0: i32) -> (i32, i32) {
    %c0_i32 = arith.constant 0 : i32
    %c0_i32_0 = arith.constant 0 : i32
    return %arg0, %c0_i32 : i32, i32
  }
  func.func @transform_1(%arg0: i32) -> (i32, i32) {
    %c0_i32 = arith.constant 0 : i32
    %c0_i32_0 = arith.constant 0 : i32
    return %arg0, %c0_i32 : i32, i32
  }
  func.func @transform_2(%arg0: i32) -> (i32, i32) {
    %c0_i32 = arith.constant 0 : i32
    %c0_i32_0 = arith.constant 0 : i32
    return %c0_i32, %arg0 : i32, i32
  }
}

</mosaic_0001>

<bundles_post_ra>
// kernel: tpu_custom_call.1
= control target key start
LH: loop header
LB: loop body
LE: loop exit
PB: predicated region body
PF: predicated region fallthrough
CT: control target
= control target key end

     0   :  { %7 = vsyncpa [#allocation3], 0  ;;  %s232_s0 = inlined_call_operand.hbm [shape: f32[8,256], index: 0, kind: input, shape index: {}]   ;;  %s233_s1 = inlined_call_operand.hbm [shape: f32[8,256], index: 1, kind: input, shape index: {}]   ;;  %s234_s2 = inlined_call_operand.hbm [shape: f32[1,128], index: 2, kind: output, shape index: {}]  }
   0x1   :  { %8 = vsyncpa [#allocation6], 0 }
   0x2   :  { %9 = vsyncpa [#allocation4], 0  ;;  %s177_s9 = smov [#allocation2]   ;;  %s178_s11 = smov [#allocation5]  }
   0x3   :  { %s16_s10 = sshll.u32 %s177_s9, 4  ;;  %s26_s12 = sshll.u32 %s178_s11, 4  ;;  %s17_s10 = int_to_ptr.vmem [resolvable:$true] %s16_s10  ;;  %s27_s12 = int_to_ptr.vmem [resolvable:$true] %s26_s12 }
   0x4   :  { %s105_s15 = scalar_lea.hbm %s232_s0, 256 }
   0x5   :  { %p106_p0 = scmp.ne.s32.totalorder %s232_s0, %s105_s15  ;;  %p109_p1 = scmp.lt.u32.totalorder %s105_s15, %s232_s0 }
   0x7   :  { %p111_p2 = pnand %p109_p1, %p106_p0 }
   0x9   :  { %114 = shalt.err (!%p111_p2)
}
   0xa   :  { %s115_s20 = scalar_lea.vmem %s17_s10, 256  ;;  %p120_p4 = scmp.lt.s32.totalorder %s17_s10, %s17_s10 }
   0xb   :  { %p116_p3 = scmp.ne.s32.totalorder %s17_s10, %s115_s20  ;;  %p121_p5 = scmp.lt.s32.totalorder %s115_s20, %s115_s20 }
   0xd   :  { %p122_p6 = por %p121_p5, %p120_p4 }
   0xf   :  { %p123_p7 = pnand %p122_p6, %p116_p3 }
  0x11   :  { %126 = shalt.err (!%p123_p7)
}
  0x12   :  { %19 = dma.hbm_to_vmem [thread:$0]  %s232_s0, 256, %s17_s10, [#allocation3]  }
  0x13   :  { %s127_s25 = scalar_lea.hbm %s233_s1, 256 }
  0x14   :  { %p128_p8 = scmp.ne.s32.totalorder %s233_s1, %s127_s25  ;;  %p131_p9 = scmp.lt.u32.totalorder %s127_s25, %s233_s1 }
  0x16   :  { %p133_p10 = pnand %p131_p9, %p128_p8 }
  0x18   :  { %136 = shalt.err (!%p133_p10)
}
  0x19   :  { %s137_s30 = scalar_lea.vmem %s27_s12, 256  ;;  %p142_p12 = scmp.lt.s32.totalorder %s27_s12, %s27_s12 }
  0x1a   :  { %p138_p11 = scmp.ne.s32.totalorder %s27_s12, %s137_s30  ;;  %p143_p13 = scmp.lt.s32.totalorder %s137_s30, %s137_s30 }
  0x1c   :  { %p144_p0 = por %p143_p13, %p142_p12 }
  0x1e   :  { %p145_p1 = pnand %p144_p0, %p138_p11 }
  0x20   :  { %148 = shalt.err (!%p145_p1)
}
  0x21   :  { %29 = dma.hbm_to_vmem [thread:$0]  %s233_s1, 256, %s27_s12, [#allocation6]  }
  0x22   :  { %171 = dma.done.wait [#allocation3], 256  }
  0x23   :  { %172 = vsyncadd [#allocation3], 4294967040 }
  0x24   :  { %173 = dma.done.wait [#allocation6], 256  }
  0x25   :  { %174 = vsyncadd [#allocation6], 4294967040  ;;  %v38_v0 = vld [vmem:[#allocation5] sm:$0xff]  ;;  %v39_v1 = vld [vmem:[#allocation5 + $0x8] sm:$0xff]  ;;  %v179_v5 = vmov 0.0   ;;  %vm68_vm2 = vcmask 7168  }
  0x26   :  { %v36_v2 = vld [vmem:[#allocation2] sm:$0xff]  ;;  %vm44_vm0 = vcmp.ne.f32.partialorder %v38_v0, 0.0  ;;  %vm45_vm1 = vcmp.ne.f32.partialorder %v39_v1, 0.0  ;;  %v37_v3 = vld [vmem:[#allocation2 + $0x8] sm:$0xff]  ;;  %s180_s1 = smov [#allocation7]  }
  0x27   :  { %v40_v4 = vsub.f32 %v36_v2, %v38_v0  ;;  %v97_v6 = vsel %vm44_vm0, 1.0, %v179_v5  ;;  %v98_v7 = vsel %vm45_vm1, 1.0, %v179_v5  ;;  %v41_v8 = vsub.f32 %v37_v3, %v39_v1  ;;  %s87_s4 = sshll.u32 %s180_s1, 4  ;;  %s88_s4 = int_to_ptr.vmem [resolvable:$true] %s87_s4 }
  0x28   :  { %v58_v9 = vadd.f32 %v98_v7, %v97_v6  ;;  %s149_s6 = scalar_lea.vmem %s88_s4, 16  ;;  %s153_s7 = scalar_lea.vmem %s88_s4, 32 }
  0x29   :  { %v42_v10 = vmul.f32 %v40_v4, %v40_v4  ;;  %v43_v11 = vmul.f32 %v41_v8, %v41_v8  ;;  %p150_p2 = scmp.ne.s32.totalorder %s88_s4, %s149_s6  ;;  %p154_p3 = scmp.lt.s32.totalorder %s88_s4, %s88_s4 }
  0x2a   :  { %59 = vadd.xlane.f32.xlu0 %v58_v9  ;;  %p155_p4 = scmp.lt.s32.totalorder %s153_s7, %s149_s6 }
  0x2b   :  { %v53_v12 = vmul.f32 %v97_v6, %v42_v10  ;;  %v54_v13 = vmul.f32 %v98_v7, %v43_v11  ;;  %v50_v14 = vadd.f32 %v43_v11, %v42_v10 }
  0x2c   :  { %p156_p5 = por %p155_p4, %p154_p3 }
  0x2d   :  { %v55_v15 = vadd.f32 %v54_v13, %v53_v12 }
  0x2e   :  { %51 = vadd.xlane.f32.xlu0 %v50_v14  ;;  %p157_p6 = pnand %p156_p5, %p150_p2 }
  0x2f   :  { %56 = vadd.xlane.f32.xlu1 %v55_v15 }
  0xb7   :  { %v60_v16 = vpop.xlane.xlu0 %59 }
  0xb8   :  { %v61_v17 = vmul.f32 0.00390625, %v60_v16 }
  0xba   :  { %v62_v18 = vsub.f32 1.0, %v61_v17 }
  0xbb   :  { %v52_v19 = vpop.xlane.xlu0 %51 }
  0xbc   :  { %v64_v20 = vsub.f32 1.0, %v62_v18  ;;  %v57_v21 = vpop.xlane.xlu1 %56 }
  0xbd   :  { %v65_v22 = vsub.f32 %v52_v19, %v57_v21  ;;  %v63_v23 = vmul.f32 %v62_v18, %v57_v21 }
  0xbf   :  { %v66_v24 = vmul.f32 %v65_v22, %v64_v20 }
  0xc1   :  { %v67_v25 = vadd.f32 %v66_v24, %v63_v23 }
  0xc3   :  { %v69_v26 = vsel %vm68_vm2, %v67_v25, 0.0 }
  0xc4   :  { %70 = vadd.xlane.f32.xlu1 %v69_v26 }
 0x151   :  { %v71_v27 = vpop.xlane.xlu1 %70 }
 0x152   :  { %v72_v28 = vrot.slane %v71_v27, 4 }
 0x154   :  { %v73_v29 = vadd.f32 %v72_v28, %v71_v27 }
 0x156   :  { %v74_v30 = vrot.slane %v73_v29, 2 }
 0x158   :  { %v75_v31 = vadd.f32 %v74_v30, %v73_v29 }
 0x15a   :  { %v76_v32 = vrot.slane %v75_v31, 1 }
 0x15c   :  { %v77_v33 = vadd.f32 %v76_v32, %v75_v31 }
 0x15e   :  { %99 = vpush %v77_v33 }
 0x18f   :  { %s100_s5 = spop %99 }
 0x190   :  { %v79_v34 = vstv %s100_s5 }
 0x191   :  { %80 = vst [vmem:[#allocation7] sm:$0x1] %v79_v34 }
 0x192   :  { %160 = shalt.err (!%p157_p6)
}
 0x193   :  { %s161_s10 = scalar_lea.hbm %s234_s2, 16 }
 0x194   :  { %p162_p7 = scmp.ne.s32.totalorder %s234_s2, %s161_s10  ;;  %p165_p8 = scmp.lt.u32.totalorder %s161_s10, %s234_s2 }
 0x196   :  { %p167_p9 = pnand %p165_p8, %p162_p7 }
 0x198   :  { %170 = shalt.err (!%p167_p9)
}
 0x199   :  { %90 = dma.vmem_to_hbm [thread:$0]  %s88_s4, 16, %s234_s2, [#allocation4]  }
 0x19a   :  { %175 = dma.done.wait [#allocation4], 16  }
 0x19b   :  { %176 = vsyncadd [#allocation4], 4294967280 }
 0x19c   :  { %94 = vsyncpa [#allocation3], 1 }
 0x19d   :  { %95 = vsyncpa [#allocation6], 1 }
 0x19e   :  { %96 = vsyncpa [#allocation4], 1 }

</bundles_post_ra>
